<compile_context>
chip_gen: v5e
topology: v5e:2x2
jax: 0.10.0
libtpu: 0.0.40
codegen_flags: <defaults>
</compile_context>

<pallas_src>
import functools
import math

import jax
import jax.numpy as jnp
from jax.experimental import pallas as pl
from jax.experimental.pallas import tpu as pltpu

_LANE = 128
_BLOCK_CAP = 512  # per-axis tile cap (multiple of 128) for the large feature axes


def _pick_block(dim, cap=_BLOCK_CAP):
    """Largest multiple-of-128 divisor of `dim` that is <= cap; else full extent."""
    if dim <= cap or dim % _LANE != 0:
        return dim
    b = (cap // _LANE) * _LANE
    while b >= _LANE:
        if dim % b == 0:
            return b
        b -= _LANE
    return dim


# ---------------------------------------------------------------------------
# Encoder head: mu = x @ Wm + bm ; logvar = x @ Ws + bs ; z = mu + eps*exp(.5*logvar)
# Grid: reduction over K (the flattened conv-feature axis).
# ---------------------------------------------------------------------------
def _enc_head_kernel(x_ref, wmu_ref, bmu_ref, wsig_ref, bsig_ref, eps_ref,
                     mu_ref, logvar_ref, z_ref, acc_mu, acc_sig):
    k = pl.program_id(0)

    @pl.when(k == 0)
    def _():
        acc_mu[...] = jnp.zeros_like(acc_mu)
        acc_sig[...] = jnp.zeros_like(acc_sig)

    x = x_ref[...]
    acc_mu[...] += jnp.dot(x, wmu_ref[...], preferred_element_type=jnp.float32)
    acc_sig[...] += jnp.dot(x, wsig_ref[...], preferred_element_type=jnp.float32)

    @pl.when(k == pl.num_programs(0) - 1)
    def _():
        mu = acc_mu[...] + bmu_ref[...]
        logvar = acc_sig[...] + bsig_ref[...]
        mu_ref[...] = mu.astype(mu_ref.dtype)
        logvar_ref[...] = logvar.astype(logvar_ref.dtype)
        z = mu + eps_ref[...].astype(jnp.float32) * jnp.exp(0.5 * logvar)
        z_ref[...] = z.astype(z_ref.dtype)


def encoder_head(x, w_mu, b_mu, w_sigma, b_sigma, eps):
    """Fused: x.reshape(B, -1) -> fc_mu / fc_sigma -> reparametrize.

    x       : (B, C, H, W) conv features
    w_*     : (K, N) with K = C*H*W, N = internal_shape   (y = x @ W + b)
    b_*     : (N,)
    eps     : (B, N) standard-normal noise
    Returns (mu, logvar, z), each (B, N).
    """
    B = x.shape[0]
    K = math.prod(x.shape[1:])
    N = w_mu.shape[1]

    xf = jnp.reshape(x, (B, K))            # metadata only — no Pallas copy
    bmu2 = jnp.reshape(b_mu, (1, N))       # metadata only
    bsig2 = jnp.reshape(b_sigma, (1, N))   # metadata only

    bk = _pick_block(K)
    nk = K // bk
    itemsize = jnp.dtype(x.dtype).itemsize

    out_sds = jax.ShapeDtypeStruct((B, N), x.dtype)
    out_spec = pl.BlockSpec((B, N), lambda k: (0, 0))

    return pl.pallas_call(
        _enc_head_kernel,
        out_shape=(out_sds, out_sds, out_sds),
        grid=(nk,),
        in_specs=[
            pl.BlockSpec((B, bk), lambda k: (0, k)),
            pl.BlockSpec((bk, N), lambda k: (k, 0)),
            pl.BlockSpec((1, N), lambda k: (0, 0)),
            pl.BlockSpec((bk, N), lambda k: (k, 0)),
            pl.BlockSpec((1, N), lambda k: (0, 0)),
            pl.BlockSpec((B, N), lambda k: (0, 0)),
        ],
        out_specs=(out_spec, out_spec, out_spec),
        scratch_shapes=[pltpu.VMEM((B, N), jnp.float32),
                        pltpu.VMEM((B, N), jnp.float32)],
        compiler_params=pltpu.CompilerParams(
            dimension_semantics=("arbitrary",),
            vmem_limit_bytes=32 * 1024 * 1024,
        ),
        cost_estimate=pl.CostEstimate(
            flops=2 * 2 * B * K * N,
            transcendentals=B * N,
            bytes_accessed=(B * K + 2 * K * N + 2 * N + 4 * B * N) * itemsize,
        ),
    )(xf, w_mu, bmu2, w_sigma, bsig2, eps)


# ---------------------------------------------------------------------------
# Decoder head: out = LeakyReLU(z @ W + b, 0.2) ; then ReshapeLayer (free metadata).
# Grid: parallel over the large output-feature axis N (lane-dense stores).
# ---------------------------------------------------------------------------
def _dec_head_kernel(z_ref, w_ref, b_ref, out_ref):
    acc = jnp.dot(z_ref[...], w_ref[...], preferred_element_type=jnp.float32)
    acc = acc + b_ref[...]
    out_ref[...] = jnp.where(acc > 0, acc, 0.2 * acc).astype(out_ref.dtype)


def decoder_head(z, w, b, conv_shape):
    """Fused: fc(z) -> ReshapeLayer([-1, C, H, W]) -> LeakyReLU(0.2).

    z : (B, K) latent, w : (K, N) with N = C*H*W, b : (N,)
    Returns (B, C, H, W).
    """
    B, K = z.shape
    N = w.shape[1]
    b2 = jnp.reshape(b, (1, N))            # metadata only

    bn = _pick_block(N)
    nb = N // bn
    itemsize = jnp.dtype(z.dtype).itemsize

    out = pl.pallas_call(
        _dec_head_kernel,
        out_shape=jax.ShapeDtypeStruct((B, N), z.dtype),
        grid=(nb,),
        in_specs=[
            pl.BlockSpec((B, K), lambda n: (0, 0)),
            pl.BlockSpec((K, bn), lambda n: (0, n)),
            pl.BlockSpec((1, bn), lambda n: (0, n)),
        ],
        out_specs=pl.BlockSpec((B, bn), lambda n: (0, n)),
        compiler_params=pltpu.CompilerParams(
            dimension_semantics=("parallel",),
            vmem_limit_bytes=32 * 1024 * 1024,
        ),
        cost_estimate=pl.CostEstimate(
            flops=2 * B * K * N,
            transcendentals=0,
            bytes_accessed=(B * K + K * N + N + B * N) * itemsize,
        ),
    )(z, w, b2)

    # ReshapeLayer([-1, C, H, W]): pure metadata, zero HBM traffic, no kernel.
    return jnp.reshape(out, (B,) + tuple(conv_shape))


if __name__ == "__main__":
    key = jax.random.PRNGKey(0)
    # Small shapes consistent with the VAE: conv trunk output (B, 64, H/8, W/8)
    # for a 32x32 input => (2, 64, 4, 4); internal (latent) size 32.
    B, C, H, W = 2, 64, 4, 4
    internal = 32
    fc_shape = C * H * W  # 1024

    ks = jax.random.split(key, 8)
    x_conv = jax.random.normal(ks[0], (B, C, H, W), dtype=jnp.float32)
    w_mu = 0.02 * jax.random.normal(ks[1], (fc_shape, internal), dtype=jnp.float32)
    b_mu = 0.02 * jax.random.normal(ks[2], (internal,), dtype=jnp.float32)
    w_sig = 0.02 * jax.random.normal(ks[3], (fc_shape, internal), dtype=jnp.float32)
    b_sig = 0.02 * jax.random.normal(ks[4], (internal,), dtype=jnp.float32)
    w_dec = 0.02 * jax.random.normal(ks[5], (internal, fc_shape), dtype=jnp.float32)
    b_dec = 0.02 * jax.random.normal(ks[6], (fc_shape,), dtype=jnp.float32)
    eps = jax.random.normal(ks[7], (B, internal), dtype=jnp.float32)

    enc_fn = jax.jit(encoder_head)
    dec_fn = jax.jit(functools.partial(decoder_head, conv_shape=(C, H, W)))

    mu, logvar, z = enc_fn(x_conv, w_mu, b_mu, w_sig, b_sig, eps)
    dec_feat = dec_fn(z, w_dec, b_dec)
    jax.block_until_ready((mu, logvar, z, dec_feat))

    # Pure-JAX reference (matches the PyTorch semantics of
    # fc_mu/fc_sigma on x.reshape(-1, fc_shape), reparametrize,
    # and dec.fc + ReshapeLayer + LeakyReLU(0.2)).
    xf = x_conv.reshape(B, fc_shape)
    mu_ref = xf @ w_mu + b_mu
    logvar_ref = xf @ w_sig + b_sig
    z_ref = mu_ref + eps * jnp.exp(0.5 * logvar_ref)
    pre = z_ref @ w_dec + b_dec
    dec_ref = jnp.where(pre > 0, pre, 0.2 * pre).reshape(B, C, H, W)

    assert mu.shape == mu_ref.shape and dec_feat.shape == dec_ref.shape
    assert jnp.allclose(mu, mu_ref, rtol=1e-5, atol=1e-5)
    assert jnp.allclose(logvar, logvar_ref, rtol=1e-5, atol=1e-5)
    assert jnp.allclose(z, z_ref, rtol=1e-5, atol=1e-5)
    assert jnp.allclose(dec_feat, dec_ref, rtol=1e-5, atol=1e-5)

    print("KERNEL_OK")
</pallas_src>

<mosaic_0001>
module attributes {stable_mosaic.version = 11 : i64} {
  func.func @_enc_head_kernel(%arg0: i32, %arg1: memref<2x512xf32, #tpu.memory_space<vmem>>, %arg2: memref<512x32xf32, #tpu.memory_space<vmem>>, %arg3: memref<1x32xf32, #tpu.memory_space<vmem>>, %arg4: memref<512x32xf32, #tpu.memory_space<vmem>>, %arg5: memref<1x32xf32, #tpu.memory_space<vmem>>, %arg6: memref<2x32xf32, #tpu.memory_space<vmem>>, %arg7: memref<2x32xf32, #tpu.memory_space<vmem>>, %arg8: memref<2x32xf32, #tpu.memory_space<vmem>>, %arg9: memref<2x32xf32, #tpu.memory_space<vmem>>, %arg10: memref<2x32xf32, #tpu.memory_space<vmem>>, %arg11: memref<2x32xf32, #tpu.memory_space<vmem>>) attributes {dimension_semantics = [#tpu.dimension_semantics<arbitrary>], iteration_bounds = array<i64: 2>, scalar_prefetch = 0 : i64, scratch_operands = 2 : i64, tpu.core_type = #tpu.core_type<tc>, window_params = [{transform_indices = @transform_0, window_bounds = array<i64: 2, 512>}, {transform_indices = @transform_1, window_bounds = array<i64: 512, 32>}, {pipeline_mode = #tpu.pipeline_mode<synchronous>, transform_indices = @transform_2, window_bounds = array<i64: 1, 32>}, {transform_indices = @transform_3, window_bounds = array<i64: 512, 32>}, {pipeline_mode = #tpu.pipeline_mode<synchronous>, transform_indices = @transform_4, window_bounds = array<i64: 1, 32>}, {pipeline_mode = #tpu.pipeline_mode<synchronous>, transform_indices = @transform_5, window_bounds = array<i64: 2, 32>}, {pipeline_mode = #tpu.pipeline_mode<synchronous>, transform_indices = @transform_6, window_bounds = array<i64: 2, 32>}, {pipeline_mode = #tpu.pipeline_mode<synchronous>, transform_indices = @transform_7, window_bounds = array<i64: 2, 32>}, {pipeline_mode = #tpu.pipeline_mode<synchronous>, transform_indices = @transform_8, window_bounds = array<i64: 2, 32>}]} {
    %c0_i32 = arith.constant 0 : i32
    %0 = arith.cmpi eq, %arg0, %c0_i32 : i32
    %1 = arith.extui %0 : i1 to i32
    %c0_i32_0 = arith.constant 0 : i32
    %2 = arith.cmpi ne, %1, %c0_i32_0 : i32
    scf.if %2 {
      %cst_16 = arith.constant 0.000000e+00 : f32
      %17 = vector.broadcast %cst_16 : f32 to vector<2x32xf32>
      %c0_17 = arith.constant 0 : index
      %c0_18 = arith.constant 0 : index
      %18 = vector.load %arg10[%c0_17, %c0_18] : memref<2x32xf32, #tpu.memory_space<vmem>>, vector<2x32xf32>
      tpu.vector_store %arg10[%c0_17, %c0_18], %17 {strides = array<i32>} : memref<2x32xf32, #tpu.memory_space<vmem>>, vector<2x32xf32>,
      %cst_19 = arith.constant 0.000000e+00 : f32
      %19 = vector.broadcast %cst_19 : f32 to vector<2x32xf32>
      %c0_20 = arith.constant 0 : index
      %c0_21 = arith.constant 0 : index
      %20 = vector.load %arg11[%c0_20, %c0_21] : memref<2x32xf32, #tpu.memory_space<vmem>>, vector<2x32xf32>
      tpu.vector_store %arg11[%c0_20, %c0_21], %19 {strides = array<i32>} : memref<2x32xf32, #tpu.memory_space<vmem>>, vector<2x32xf32>,
    } else {
    }
    %c0 = arith.constant 0 : index
    %c0_1 = arith.constant 0 : index
    %3 = vector.load %arg1[%c0, %c0_1] : memref<2x512xf32, #tpu.memory_space<vmem>>, vector<2x512xf32>
    %c0_2 = arith.constant 0 : index
    %c0_3 = arith.constant 0 : index
    %4 = vector.load %arg10[%c0_2, %c0_3] : memref<2x32xf32, #tpu.memory_space<vmem>>, vector<2x32xf32>
    %c0_4 = arith.constant 0 : index
    %c0_5 = arith.constant 0 : index
    %5 = vector.load %arg2[%c0_4, %c0_5] : memref<512x32xf32, #tpu.memory_space<vmem>>, vector<512x32xf32>
    %cst = arith.constant dense<0.000000e+00> : vector<2x32xf32>
    %6 = tpu.matmul %3, %5, %cst {dimension_numbers = #tpu.dot_dimension_numbers<[1], [0], [0], [1], [0, 0, 1, 1], [], []>} : vector<2x512xf32>, vector<512x32xf32>, vector<2x32xf32> -> vector<2x32xf32>
    %7 = arith.addf %4, %6 : vector<2x32xf32>
    %c0_6 = arith.constant 0 : index
    %c0_7 = arith.constant 0 : index
    %8 = vector.load %arg10[%c0_6, %c0_7] : memref<2x32xf32, #tpu.memory_space<vmem>>, vector<2x32xf32>
    tpu.vector_store %arg10[%c0_6, %c0_7], %7 {strides = array<i32>} : memref<2x32xf32, #tpu.memory_space<vmem>>, vector<2x32xf32>,
    %c0_8 = arith.constant 0 : index
    %c0_9 = arith.constant 0 : index
    %9 = vector.load %arg11[%c0_8, %c0_9] : memref<2x32xf32, #tpu.memory_space<vmem>>, vector<2x32xf32>
    %c0_10 = arith.constant 0 : index
    %c0_11 = arith.constant 0 : index
    %10 = vector.load %arg4[%c0_10, %c0_11] : memref<512x32xf32, #tpu.memory_space<vmem>>, vector<512x32xf32>
    %cst_12 = arith.constant dense<0.000000e+00> : vector<2x32xf32>
    %11 = tpu.matmul %3, %10, %cst_12 {dimension_numbers = #tpu.dot_dimension_numbers<[1], [0], [0], [1], [0, 0, 1, 1], [], []>} : vector<2x512xf32>, vector<512x32xf32>, vector<2x32xf32> -> vector<2x32xf32>
    %12 = arith.addf %9, %11 : vector<2x32xf32>
    %c0_13 = arith.constant 0 : index
    %c0_14 = arith.constant 0 : index
    %13 = vector.load %arg11[%c0_13, %c0_14] : memref<2x32xf32, #tpu.memory_space<vmem>>, vector<2x32xf32>
    tpu.vector_store %arg11[%c0_13, %c0_14], %12 {strides = array<i32>} : memref<2x32xf32, #tpu.memory_space<vmem>>, vector<2x32xf32>,
    %c1_i32 = arith.constant 1 : i32
    %14 = arith.cmpi eq, %arg0, %c1_i32 : i32
    %15 = arith.extui %14 : i1 to i32
    %c0_i32_15 = arith.constant 0 : i32
    %16 = arith.cmpi ne, %15, %c0_i32_15 : i32
    scf.if %16 {
      %c0_16 = arith.constant 0 : index
      %c0_17 = arith.constant 0 : index
      %17 = vector.load %arg10[%c0_16, %c0_17] : memref<2x32xf32, #tpu.memory_space<vmem>>, vector<2x32xf32>
      %c0_18 = arith.constant 0 : index
      %c0_19 = arith.constant 0 : index
      %18 = vector.load %arg3[%c0_18, %c0_19] : memref<1x32xf32, #tpu.memory_space<vmem>>, vector<1x32xf32>
      %19 = vector.broadcast %18 : vector<1x32xf32> to vector<2x32xf32>
      %20 = arith.addf %17, %19 : vector<2x32xf32>
      %c0_20 = arith.constant 0 : index
      %c0_21 = arith.constant 0 : index
      %21 = vector.load %arg11[%c0_20, %c0_21] : memref<2x32xf32, #tpu.memory_space<vmem>>, vector<2x32xf32>
      %c0_22 = arith.constant 0 : index
      %c0_23 = arith.constant 0 : index
      %22 = vector.load %arg5[%c0_22, %c0_23] : memref<1x32xf32, #tpu.memory_space<vmem>>, vector<1x32xf32>
      %23 = vector.broadcast %22 : vector<1x32xf32> to vector<2x32xf32>
      %24 = arith.addf %21, %23 : vector<2x32xf32>
      %c0_24 = arith.constant 0 : index
      %c0_25 = arith.constant 0 : index
      %25 = vector.load %arg7[%c0_24, %c0_25] : memref<2x32xf32, #tpu.memory_space<vmem>>, vector<2x32xf32>
      tpu.vector_store %arg7[%c0_24, %c0_25], %20 {strides = array<i32>} : memref<2x32xf32, #tpu.memory_space<vmem>>, vector<2x32xf32>,
      %c0_26 = arith.constant 0 : index
      %c0_27 = arith.constant 0 : index
      %26 = vector.load %arg8[%c0_26, %c0_27] : memref<2x32xf32, #tpu.memory_space<vmem>>, vector<2x32xf32>
      tpu.vector_store %arg8[%c0_26, %c0_27], %24 {strides = array<i32>} : memref<2x32xf32, #tpu.memory_space<vmem>>, vector<2x32xf32>,
      %c0_28 = arith.constant 0 : index
      %c0_29 = arith.constant 0 : index
      %27 = vector.load %arg6[%c0_28, %c0_29] : memref<2x32xf32, #tpu.memory_space<vmem>>, vector<2x32xf32>
      %cst_30 = arith.constant 5.000000e-01 : f32
      %28 = vector.broadcast %cst_30 : f32 to vector<2x32xf32>
      %29 = arith.mulf %28, %24 : vector<2x32xf32>
      %30 = math.exp %29 : vector<2x32xf32>
      %31 = arith.mulf %27, %30 : vector<2x32xf32>
      %32 = arith.addf %20, %31 : vector<2x32xf32>
      %c0_31 = arith.constant 0 : index
      %c0_32 = arith.constant 0 : index
      %33 = vector.load %arg9[%c0_31, %c0_32] : memref<2x32xf32, #tpu.memory_space<vmem>>, vector<2x32xf32>
      tpu.vector_store %arg9[%c0_31, %c0_32], %32 {strides = array<i32>} : memref<2x32xf32, #tpu.memory_space<vmem>>, vector<2x32xf32>,
    } else {
    }
    return
  }
  func.func @transform_0(%arg0: i32) -> (i32, i32) {
    %c0_i32 = arith.constant 0 : i32
    %c0_i32_0 = arith.constant 0 : i32
    return %c0_i32, %arg0 : i32, i32
  }
  func.func @transform_1(%arg0: i32) -> (i32, i32) {
    %c0_i32 = arith.constant 0 : i32
    %c0_i32_0 = arith.constant 0 : i32
    return %arg0, %c0_i32 : i32, i32
  }
  func.func @transform_2(%arg0: i32) -> (i32, i32) {
    %c0_i32 = arith.constant 0 : i32
    %c0_i32_0 = arith.constant 0 : i32
    %c0_i32_1 = arith.constant 0 : i32
    return %c0_i32, %c0_i32_0 : i32, i32
  }
  func.func @transform_3(%arg0: i32) -> (i32, i32) {
    %c0_i32 = arith.constant 0 : i32
    %c0_i32_0 = arith.constant 0 : i32
    return %arg0, %c0_i32 : i32, i32
  }
  func.func @transform_4(%arg0: i32) -> (i32, i32) {
    %c0_i32 = arith.constant 0 : i32
    %c0_i32_0 = arith.constant 0 : i32
    %c0_i32_1 = arith.constant 0 : i32
    return %c0_i32, %c0_i32_0 : i32, i32
  }
  func.func @transform_5(%arg0: i32) -> (i32, i32) {
    %c0_i32 = arith.constant 0 : i32
    %c0_i32_0 = arith.constant 0 : i32
    %c0_i32_1 = arith.constant 0 : i32
    return %c0_i32, %c0_i32_0 : i32, i32
  }
  func.func @transform_6(%arg0: i32) -> (i32, i32) {
    %c0_i32 = arith.constant 0 : i32
    %c0_i32_0 = arith.constant 0 : i32
    %c0_i32_1 = arith.constant 0 : i32
    return %c0_i32, %c0_i32_0 : i32, i32
  }
  func.func @transform_7(%arg0: i32) -> (i32, i32) {
    %c0_i32 = arith.constant 0 : i32
    %c0_i32_0 = arith.constant 0 : i32
    %c0_i32_1 = arith.constant 0 : i32
    return %c0_i32, %c0_i32_0 : i32, i32
  }
  func.func @transform_8(%arg0: i32) -> (i32, i32) {
    %c0_i32 = arith.constant 0 : i32
    %c0_i32_0 = arith.constant 0 : i32
    %c0_i32_1 = arith.constant 0 : i32
    return %c0_i32, %c0_i32_0 : i32, i32
  }
}

</mosaic_0001>

<bundles_post_ra>
// kernel: encoder_head.1
= control target key start
LH: loop header
LB: loop body
LE: loop exit
PB: predicated region body
PF: predicated region fallthrough
CT: control target
= control target key end

     0   :  { %14 = vsyncpa [#allocation5], 0  ;;  %s1202_s0 = inlined_call_operand.vmem [shape: f32[2,1024], index: 0, kind: input, shape index: {}]   ;;  %s1203_s1 = inlined_call_operand.vmem [shape: f32[1024,32], index: 1, kind: input, shape index: {}]   ;;  %s1204_s2 = inlined_call_operand.vmem [shape: f32[1,32], index: 2, kind: input, shape index: {}]   ;;  %s1205_s3 = inlined_call_operand.vmem [shape: f32[1024,32], index: 3, kind: input, shape index: {}]   ;;  %s1206_s4 = inlined_call_operand.vmem [shape: f32[1,32], index: 4, kind: input, shape index: {}]   ;;  %s1207_s5 = inlined_call_operand.vmem [shape: f32[2,32], index: 5, kind: input, shape index: {}]   ;;  %s1208_s6 = inlined_call_operand.hbm [shape: f32[2,32], index: 6, kind: output, shape index: {0}]   ;;  %s1209_s7 = inlined_call_operand.hbm [shape: f32[2,32], index: 7, kind: output, shape index: {1}]   ;;  %s1210_s8 = inlined_call_operand.hbm [shape: f32[2,32], index: 8, kind: output, shape index: {2}]  }
   0x1   :  { %15 = vsyncpa [#allocation7], 0  ;;  %s1003_s27 = smov 0  }
   0x2 LB: > { %s1009_s28 = sadd.s32 4294967295, %s952_s27   ;;  %p803_p0 = scmp.ge.s32.totalorder %s952_s27, 1  ;;  %s952_s27 = sphi %s1003_s27, %s21_s27  }
   0x3   : > { %p277_p1 = scmp.lt.s32.totalorder %s952_s27, 3 }
   0x5   : > { %p278_p2 = pnand %p803_p0, %p277_p1 }
   0x6   : > { %s804_s29 = sshll.u32 (!%p278_p2), %s1009_s28, 2  ;;  %s806_s30 = sshll.u32 (!%p278_p2), %s1009_s28, 6 }
   0x7   : > { %281 = sbr.rel (%p278_p2) target bundleno = 265 (0x109), region = 44  ;;  %p317_p3 = scmp.lt.s32.totalorder (!%p278_p2), %s804_s29, 7 }
   0x8   : > { %p323_p4 = scmp.lt.s32.totalorder (!%p278_p2), %s806_s30, 127  ;;  %p810_p5 = scmp.ne.s32.totalorder (!%p278_p2), %s1009_s28, 0 }
   0xc   : > { %s1212_s29 = smov (!%p317_p3, %s804_s29), 7  ;;  %s1214_s30 = smov (!%p323_p4, %s806_s30), 127 }
   0xd   : > { %s805_s9 = sshll.u32 %s1212_s29, 1  ;;  %s807_s13 = sshll.u32 %s1214_s30, 3 }
   0xe   : > { %s1018_s12 = scalar_lea.vmem %s1202_s0, %s805_s9  ;;  %s1023_s16 = scalar_lea.vmem %s1203_s1, %s807_s13 }
   0xf   : > { %s1028_s19 = scalar_lea.vmem %s1205_s3, %s807_s13  ;;  %337 = sbr.rel (%p810_p5) target bundleno = 23 (0x17), region = 48 }
  0x14   : > { %vm338_vm0 = vcmask 254976   ;;  %v954_v0 = vmov 0.0  }
  0x15   : > { %339 = vst.msk [vmem:[#allocation2] sm:$0x3] %vm338_vm0, %v954_v0 }
  0x16   : > { %340 = vst.msk [vmem:[#allocation3] sm:$0x3] %vm338_vm0, %v954_v0 }
  0x17 PF: > { %v390_v1 = vld [vmem:[%s1023_s16 + $0x178] sm:$0xff]  ;;  %v389_v2 = vld [vmem:[%s1023_s16 + $0x170] sm:$0xff]  ;;  %v388_v6 = vld [vmem:[%s1023_s16 + $0x168] sm:$0xff]  ;;  %vm498_vm1 = vcmask 254976   ;;  %p811_p6 = scmp.ne.s32.totalorder %s1009_s28, 1 }
  0x18   : > { %v406_v3 = vld [vmem:[%s1023_s16 + $0x1f8] sm:$0xff]  ;;  %457 = vmatpush.msra.mxu2 %v390_v1  ;;  %v405_v7 = vld [vmem:[%s1023_s16 + $0x1f0] sm:$0xff]  ;;  %v404_v10 = vld [vmem:[%s1023_s16 + $0x1e8] sm:$0xff] }
  0x19   : > { %477 = vmatpush.msra.mxu3 %v406_v3  ;;  %v358_v4 = vld [vmem:[%s1023_s16 + $0x78] sm:$0xff]  ;;  %v357_v8 = vld [vmem:[%s1023_s16 + $0x70] sm:$0xff]  ;;  %v356_v11 = vld [vmem:[%s1023_s16 + $0x68] sm:$0xff] }
  0x1a   : > { %v374_v5 = vld [vmem:[%s1023_s16 + $0xf8] sm:$0xff]  ;;  %417 = vmatpush.msra.mxu0 %v358_v4  ;;  %v373_v9 = vld [vmem:[%s1023_s16 + $0xf0] sm:$0xff]  ;;  %458 = vmatpush.msra.mxu2 %v389_v2  ;;  %v387_v12 = vld [vmem:[%s1023_s16 + $0x160] sm:$0xff] }
  0x1b   : > { %437 = vmatpush.msra.mxu1 %v374_v5  ;;  %478 = vmatpush.msra.mxu3 %v405_v7  ;;  %v372_v13 = vld [vmem:[%s1023_s16 + $0xe8] sm:$0xff]  ;;  %v403_v14 = vld [vmem:[%s1023_s16 + $0x1e0] sm:$0xff]  ;;  %v386_v17 = vld [vmem:[%s1023_s16 + $0x158] sm:$0xff] }
  0x1c   : > { %418 = vmatpush.msra.mxu0 %v357_v8  ;;  %459 = vmatpush.msra.mxu2 %v388_v6  ;;  %v355_v15 = vld [vmem:[%s1023_s16 + $0x60] sm:$0xff]  ;;  %v402_v18 = vld [vmem:[%s1023_s16 + $0x1d8] sm:$0xff]  ;;  %v385_v21 = vld [vmem:[%s1023_s16 + $0x150] sm:$0xff] }
  0x1d   : > { %438 = vmatpush.msra.mxu1 %v373_v9  ;;  %479 = vmatpush.msra.mxu3 %v404_v10  ;;  %v371_v16 = vld [vmem:[%s1023_s16 + $0xe0] sm:$0xff]  ;;  %v354_v19 = vld [vmem:[%s1023_s16 + $0x58] sm:$0xff]  ;;  %v401_v22 = vld [vmem:[%s1023_s16 + $0x1d0] sm:$0xff] }
  0x1e   : > { %419 = vmatpush.msra.mxu0 %v356_v11  ;;  %460 = vmatpush.msra.mxu2 %v387_v12  ;;  %v370_v20 = vld [vmem:[%s1023_s16 + $0xd8] sm:$0xff]  ;;  %v353_v23 = vld [vmem:[%s1023_s16 + $0x50] sm:$0xff]  ;;  %v384_v25 = vld [vmem:[%s1023_s16 + $0x148] sm:$0xff] }
  0x1f   : > { %439 = vmatpush.msra.mxu1 %v372_v13  ;;  %480 = vmatpush.msra.mxu3 %v403_v14  ;;  %v369_v24 = vld [vmem:[%s1023_s16 + $0xd0] sm:$0xff]  ;;  %v400_v26 = vld [vmem:[%s1023_s16 + $0x1c8] sm:$0xff]  ;;  %v383_v29 = vld [vmem:[%s1023_s16 + $0x140] sm:$0xff] }
  0x20   : > { %420 = vmatpush.msra.mxu0 %v355_v15  ;;  %461 = vmatpush.msra.mxu2 %v386_v17  ;;  %v352_v27 = vld [vmem:[%s1023_s16 + $0x48] sm:$0xff]  ;;  %v399_v30 = vld [vmem:[%s1023_s16 + $0x1c0] sm:$0xff]  ;;  %v382_v33 = vld [vmem:[%s1023_s16 + $0x138] sm:$0xff] }
  0x21   : > { %440 = vmatpush.msra.mxu1 %v371_v16  ;;  %481 = vmatpush.msra.mxu3 %v402_v18  ;;  %v368_v28 = vld [vmem:[%s1023_s16 + $0xc8] sm:$0xff]  ;;  %v351_v31 = vld [vmem:[%s1023_s16 + $0x40] sm:$0xff]  ;;  %v398_v34 = vld [vmem:[%s1023_s16 + $0x1b8] sm:$0xff] }
  0x22   : > { %421 = vmatpush.msra.mxu0 %v354_v19  ;;  %462 = vmatpush.msra.mxu2 %v385_v21  ;;  %v367_v32 = vld [vmem:[%s1023_s16 + $0xc0] sm:$0xff]  ;;  %v350_v35 = vld [vmem:[%s1023_s16 + $0x38] sm:$0xff]  ;;  %v381_v37 = vld [vmem:[%s1023_s16 + $0x130] sm:$0xff] }
  0x23   : > { %441 = vmatpush.msra.mxu1 %v370_v20  ;;  %482 = vmatpush.msra.mxu3 %v401_v22  ;;  %v366_v36 = vld [vmem:[%s1023_s16 + $0xb8] sm:$0xff]  ;;  %v397_v38 = vld [vmem:[%s1023_s16 + $0x1b0] sm:$0xff]  ;;  %v380_v41 = vld [vmem:[%s1023_s16 + $0x128] sm:$0xff] }
  0x24   : > { %422 = vmatpush.msra.mxu0 %v353_v23  ;;  %463 = vmatpush.msra.mxu2 %v384_v25  ;;  %v349_v39 = vld [vmem:[%s1023_s16 + $0x30] sm:$0xff]  ;;  %v396_v42 = vld [vmem:[%s1023_s16 + $0x1a8] sm:$0xff]  ;;  %v379_v45 = vld [vmem:[%s1023_s16 + $0x120] sm:$0xff] }
  0x25   : > { %442 = vmatpush.msra.mxu1 %v369_v24  ;;  %483 = vmatpush.msra.mxu3 %v400_v26  ;;  %v365_v40 = vld [vmem:[%s1023_s16 + $0xb0] sm:$0xff]  ;;  %v348_v43 = vld [vmem:[%s1023_s16 + $0x28] sm:$0xff]  ;;  %v395_v46 = vld [vmem:[%s1023_s16 + $0x1a0] sm:$0xff] }
  0x26   : > { %423 = vmatpush.msra.mxu0 %v352_v27  ;;  %464 = vmatpush.msra.mxu2 %v383_v29  ;;  %v364_v44 = vld [vmem:[%s1023_s16 + $0xa8] sm:$0xff]  ;;  %v347_v47 = vld [vmem:[%s1023_s16 + $0x20] sm:$0xff]  ;;  %v378_v49 = vld [vmem:[%s1023_s16 + $0x118] sm:$0xff] }
  0x27   : > { %443 = vmatpush.msra.mxu1 %v368_v28  ;;  %484 = vmatpush.msra.mxu3 %v399_v30  ;;  %v363_v48 = vld [vmem:[%s1023_s16 + $0xa0] sm:$0xff]  ;;  %v394_v50 = vld [vmem:[%s1023_s16 + $0x198] sm:$0xff]  ;;  %v377_v53 = vld [vmem:[%s1023_s16 + $0x110] sm:$0xff] }
  0x28   : > { %424 = vmatpush.msra.mxu0 %v351_v31  ;;  %465 = vmatpush.msra.mxu2 %v382_v33  ;;  %v346_v51 = vld [vmem:[%s1023_s16 + $0x18] sm:$0xff]  ;;  %v393_v54 = vld [vmem:[%s1023_s16 + $0x190] sm:$0xff]  ;;  %v376_v57 = vld [vmem:[%s1023_s16 + $0x108] sm:$0xff] }
  0x29   : > { %444 = vmatpush.msra.mxu1 %v367_v32  ;;  %485 = vmatpush.msra.mxu3 %v398_v34  ;;  %v362_v52 = vld [vmem:[%s1023_s16 + $0x98] sm:$0xff]  ;;  %v345_v55 = vld [vmem:[%s1023_s16 + $0x10] sm:$0xff]  ;;  %v392_v58 = vld [vmem:[%s1023_s16 + $0x188] sm:$0xff] }
  0x2a   : > { %425 = vmatpush.msra.mxu0 %v350_v35  ;;  %466 = vmatpush.msra.mxu2 %v381_v37  ;;  %v361_v56 = vld [vmem:[%s1023_s16 + $0x90] sm:$0xff]  ;;  %v344_v59 = vld [vmem:[%s1023_s16 + $0x8] sm:$0xff]  ;;  %v375_v61 = vld [vmem:[%s1023_s16 + $0x100] sm:$0xff] }
  0x2b   : > { %445 = vmatpush.msra.mxu1 %v366_v36  ;;  %486 = vmatpush.msra.mxu3 %v397_v38  ;;  %v360_v60 = vld [vmem:[%s1023_s16 + $0x88] sm:$0xff]  ;;  %v391_v62 = vld [vmem:[%s1023_s16 + $0x180] sm:$0xff]  ;;  %v548_v63 = vld [vmem:[%s1028_s19 + $0x178] sm:$0xff] }
  0x2c   : > { %426 = vmatpush.msra.mxu0 %v349_v39  ;;  %467 = vmatpush.msra.mxu2 %v380_v41  ;;  %v564_v0 = vld [vmem:[%s1028_s19 + $0x1f8] sm:$0xff]  ;;  %v343_v1 = vld [vmem:[%s1023_s16] sm:$0xff]  ;;  %v547_v3 = vld [vmem:[%s1028_s19 + $0x170] sm:$0xff] }
  0x2d   : > { %446 = vmatpush.msra.mxu1 %v365_v40  ;;  %487 = vmatpush.msra.mxu3 %v396_v42  ;;  %v359_v2 = vld [vmem:[%s1023_s16 + $0x80] sm:$0xff]  ;;  %v516_v4 = vld [vmem:[%s1028_s19 + $0x78] sm:$0xff]  ;;  %v563_v6 = vld [vmem:[%s1028_s19 + $0x1f0] sm:$0xff] }
  0x2e   : > { %427 = vmatpush.msra.mxu0 %v348_v43  ;;  %468 = vmatpush.msra.mxu2 %v379_v45  ;;  %v532_v5 = vld [vmem:[%s1028_s19 + $0xf8] sm:$0xff]  ;;  %v546_v7 = vld [vmem:[%s1028_s19 + $0x168] sm:$0xff]  ;;  %v515_v8 = vld [vmem:[%s1028_s19 + $0x70] sm:$0xff] }
  0x2f   : > { %447 = vmatpush.msra.mxu1 %v364_v44  ;;  %488 = vmatpush.msra.mxu3 %v395_v46  ;;  %v531_v9 = vld [vmem:[%s1028_s19 + $0xf0] sm:$0xff]  ;;  %v562_v10 = vld [vmem:[%s1028_s19 + $0x1e8] sm:$0xff]  ;;  %v545_v11 = vld [vmem:[%s1028_s19 + $0x160] sm:$0xff] }
  0x30   : > { %428 = vmatpush.msra.mxu0 %v347_v47  ;;  %469 = vmatpush.msra.mxu2 %v378_v49  ;;  %v514_v12 = vld [vmem:[%s1028_s19 + $0x68] sm:$0xff]  ;;  %v341_v13 = vld [vmem:[%s1018_s12] sm:$0xff]  ;;  %v544_v16 = vld [vmem:[%s1028_s19 + $0x158] sm:$0xff] }
  0x31   : > { %448 = vmatpush.msra.mxu1 %v363_v48  ;;  %489 = vmatpush.msra.mxu3 %v394_v50  ;;  %v530_v14 = vld [vmem:[%s1028_s19 + $0xe8] sm:$0xff]  ;;  %v561_v15 = vld [vmem:[%s1028_s19 + $0x1e0] sm:$0xff]  ;;  %408 = vst [vmem:[#allocation1] ss:$4 sm:$0xff] %v341_v13  ;;  %v560_v19 = vld [vmem:[%s1028_s19 + $0x1d8] sm:$0xff] }
  0x32   : > { %429 = vmatpush.msra.mxu0 %v346_v51  ;;  %470 = vmatpush.msra.mxu2 %v377_v53  ;;  %v513_v17 = vld [vmem:[%s1028_s19 + $0x60] sm:$0xff]  ;;  %v543_v20 = vld [vmem:[%s1028_s19 + $0x150] sm:$0xff]  ;;  %v512_v21 = vld [vmem:[%s1028_s19 + $0x58] sm:$0xff] }
  0x33   : > { %449 = vmatpush.msra.mxu1 %v362_v52  ;;  %490 = vmatpush.msra.mxu3 %v393_v54  ;;  %v529_v18 = vld [vmem:[%s1028_s19 + $0xe0] sm:$0xff]  ;;  %v528_v22 = vld [vmem:[%s1028_s19 + $0xd8] sm:$0xff]  ;;  %v542_v23 = vld [vmem:[%s1028_s19 + $0x148] sm:$0xff] }
  0x34   : > { %430 = vmatpush.msra.mxu0 %v345_v55  ;;  %471 = vmatpush.msra.mxu2 %v376_v57  ;;  %v559_v24 = vld [vmem:[%s1028_s19 + $0x1d0] sm:$0xff]  ;;  %v541_v27 = vld [vmem:[%s1028_s19 + $0x140] sm:$0xff]  ;;  %v558_v28 = vld [vmem:[%s1028_s19 + $0x1c8] sm:$0xff] }
  0x35   : > { %450 = vmatpush.msra.mxu1 %v361_v56  ;;  %491 = vmatpush.msra.mxu3 %v392_v58  ;;  %v511_v25 = vld [vmem:[%s1028_s19 + $0x50] sm:$0xff]  ;;  %v510_v29 = vld [vmem:[%s1028_s19 + $0x48] sm:$0xff]  ;;  %v557_v31 = vld [vmem:[%s1028_s19 + $0x1c0] sm:$0xff] }
  0x36   : > { %431 = vmatpush.msra.mxu0 %v344_v59  ;;  %472 = vmatpush.msra.mxu2 %v375_v61  ;;  %v527_v26 = vld [vmem:[%s1028_s19 + $0xd0] sm:$0xff]  ;;  %v526_v30 = vld [vmem:[%s1028_s19 + $0xc8] sm:$0xff]  ;;  %v540_v36 = vld [vmem:[%s1028_s19 + $0x138] sm:$0xff] }
  0x37   : > { %451 = vmatpush.msra.mxu1 %v360_v60  ;;  %492 = vmatpush.msra.mxu3 %v391_v62  ;;  %v509_v37 = vld [vmem:[%s1028_s19 + $0x40] sm:$0xff]  ;;  %v556_v39 = vld [vmem:[%s1028_s19 + $0x1b8] sm:$0xff]  ;;  %v539_v40 = vld [vmem:[%s1028_s19 + $0x130] sm:$0xff] }
  0x38   : > { %614 = vmatpush.msrb.mxu2 %v548_v63  ;;  %432 = vmatpush.msra.mxu0 %v343_v1  ;;  %v411_v32 = vld.sshfl [vmem:[#allocation1 + $0x10] sm:$0xff pattern:$0x73625140]  ;;  %v412_v33 = vld.sshfl [vmem:[#allocation1 + $0x18] sm:$0xff pattern:$0x73625140] }
  0x39   : > { %634 = vmatpush.msrb.mxu3 %v564_v0  ;;  %452 = vmatpush.msra.mxu1 %v359_v2  ;;  %v409_v34 = vld.sshfl [vmem:[#allocation1] sm:$0xff pattern:$0x73625140]  ;;  %v410_v35 = vld.sshfl [vmem:[#allocation1 + $0x8] sm:$0xff pattern:$0x73625140] }
  0x3a   : > { %615 = vmatpush.msrb.mxu2 %v547_v3  ;;  %574 = vmatpush.msrb.mxu0 %v516_v4  ;;  %565 = vst [vmem:[#allocation1] ss:$4 sm:$0xff] %v341_v13  ;;  %v525_v38 = vld [vmem:[%s1028_s19 + $0xc0] sm:$0xff]  ;;  %v508_v41 = vld [vmem:[%s1028_s19 + $0x38] sm:$0xff]  ;;  %v555_v43 = vld [vmem:[%s1028_s19 + $0x1b0] sm:$0xff] }
  0x3b   : > { %594 = vmatpush.msrb.mxu1 %v532_v5  ;;  %635 = vmatpush.msrb.mxu3 %v563_v6  ;;  %v524_v42 = vld [vmem:[%s1028_s19 + $0xb8] sm:$0xff]  ;;  %v538_v44 = vld [vmem:[%s1028_s19 + $0x128] sm:$0xff]  ;;  %v507_v45 = vld [vmem:[%s1028_s19 + $0x30] sm:$0xff] }
  0x3c   : > { %616 = vmatpush.msrb.mxu2 %v546_v7  ;;  %575 = vmatpush.msrb.mxu0 %v515_v8  ;;  %v523_v46 = vld [vmem:[%s1028_s19 + $0xb0] sm:$0xff]  ;;  %v554_v47 = vld [vmem:[%s1028_s19 + $0x1a8] sm:$0xff]  ;;  %v537_v48 = vld [vmem:[%s1028_s19 + $0x120] sm:$0xff] }
  0x3d   : > { %595 = vmatpush.msrb.mxu1 %v531_v9  ;;  %636 = vmatpush.msrb.mxu3 %v562_v10  ;;  %v506_v49 = vld [vmem:[%s1028_s19 + $0x28] sm:$0xff]  ;;  %v536_v51 = vld [vmem:[%s1028_s19 + $0x118] sm:$0xff]  ;;  %v553_v52 = vld [vmem:[%s1028_s19 + $0x1a0] sm:$0xff] }
  0x3e   : > { %617 = vmatpush.msrb.mxu2 %v545_v11  ;;  %576 = vmatpush.msrb.mxu0 %v514_v12  ;;  %v522_v50 = vld [vmem:[%s1028_s19 + $0xa8] sm:$0xff]  ;;  %v505_v53 = vld [vmem:[%s1028_s19 + $0x20] sm:$0xff]  ;;  %v535_v55 = vld [vmem:[%s1028_s19 + $0x110] sm:$0xff] }
  0x3f   : > { %596 = vmatpush.msrb.mxu1 %v530_v14  ;;  %637 = vmatpush.msrb.mxu3 %v561_v15  ;;  %v521_v54 = vld [vmem:[%s1028_s19 + $0xa0] sm:$0xff]  ;;  %v552_v56 = vld [vmem:[%s1028_s19 + $0x198] sm:$0xff]  ;;  %v534_v59 = vld [vmem:[%s1028_s19 + $0x108] sm:$0xff] }
  0x40   : > { %618 = vmatpush.msrb.mxu2 %v544_v16  ;;  %577 = vmatpush.msrb.mxu0 %v513_v17  ;;  %v504_v57 = vld [vmem:[%s1028_s19 + $0x18] sm:$0xff]  ;;  %v551_v60 = vld [vmem:[%s1028_s19 + $0x190] sm:$0xff]  ;;  %v533_v63 = vld [vmem:[%s1028_s19 + $0x100] sm:$0xff] }
  0x41   : > { %597 = vmatpush.msrb.mxu1 %v529_v18  ;;  %638 = vmatpush.msrb.mxu3 %v560_v19  ;;  %v520_v58 = vld [vmem:[%s1028_s19 + $0x98] sm:$0xff]  ;;  %v503_v61 = vld [vmem:[%s1028_s19 + $0x10] sm:$0xff]  ;;  %v550_v0 = vld [vmem:[%s1028_s19 + $0x188] sm:$0xff] }
  0x42   : > { %619 = vmatpush.msrb.mxu2 %v543_v20  ;;  %578 = vmatpush.msrb.mxu0 %v512_v21  ;;  %v519_v62 = vld [vmem:[%s1028_s19 + $0x90] sm:$0xff]  ;;  %v502_v2 = vld [vmem:[%s1028_s19 + $0x8] sm:$0xff]  ;;  %v549_v4 = vld [vmem:[%s1028_s19 + $0x180] sm:$0xff] }
  0x43   : > { %598 = vmatpush.msrb.mxu1 %v528_v22  ;;  %639 = vmatpush.msrb.mxu3 %v559_v24  ;;  %v568_v1 = vld.sshfl [vmem:[#allocation1 + $0x10] sm:$0xff pattern:$0x73625140]  ;;  %v518_v3 = vld [vmem:[%s1028_s19 + $0x88] sm:$0xff]  ;;  %v501_v6 = vld [vmem:[%s1028_s19] sm:$0xff] }
  0x44   : > { %620 = vmatpush.msrb.mxu2 %v542_v23  ;;  %579 = vmatpush.msrb.mxu0 %v511_v25  ;;  %v569_v5 = vld.sshfl [vmem:[#allocation1 + $0x18] sm:$0xff pattern:$0x73625140]  ;;  %v517_v7 = vld [vmem:[%s1028_s19 + $0x80] sm:$0xff]  ;;  %v342_v16 = vld [vmem:[#allocation2] sm:$0x3] }
  0x45   : > { %599 = vmatpush.msrb.mxu1 %v527_v26  ;;  %640 = vmatpush.msrb.mxu3 %v558_v28  ;;  %v566_v8 = vld.sshfl [vmem:[#allocation1] sm:$0xff pattern:$0x73625140]  ;;  %v567_v9 = vld.sshfl [vmem:[#allocation1 + $0x8] sm:$0xff pattern:$0x73625140] }
  0x46   : > { %621 = vmatpush.msrb.mxu2 %v541_v27  ;;  %580 = vmatpush.msrb.mxu0 %v510_v29  ;;  %v500_v24 = vld [vmem:[#allocation3] sm:$0x3] }
  0x47   : > { %600 = vmatpush.msrb.mxu1 %v526_v30  ;;  %641 = vmatpush.msrb.mxu3 %v557_v31 }
  0x48   : > { %622 = vmatpush.msrb.mxu2 %v540_v36  ;;  %581 = vmatpush.msrb.mxu0 %v509_v37 }
  0x49   : > { %601 = vmatpush.msrb.mxu1 %v525_v38  ;;  %642 = vmatpush.msrb.mxu3 %v556_v39 }
  0x4a   : > { %623 = vmatpush.msrb.mxu2 %v539_v40  ;;  %582 = vmatpush.msrb.mxu0 %v508_v41 }
  0x4b   : > { %602 = vmatpush.msrb.mxu1 %v524_v42  ;;  %643 = vmatpush.msrb.mxu3 %v555_v43 }
  0x4c   : > { %624 = vmatpush.msrb.mxu2 %v538_v44  ;;  %583 = vmatpush.msrb.mxu0 %v507_v45 }
  0x4d   : > { %603 = vmatpush.msrb.mxu1 %v523_v46  ;;  %644 = vmatpush.msrb.mxu3 %v554_v47 }
  0x4e   : > { %625 = vmatpush.msrb.mxu2 %v537_v48  ;;  %584 = vmatpush.msrb.mxu0 %v506_v49 }
  0x4f   : > { %473 = vmatmul.f32.vlgmr.msra.gmra.mxu2 %v411_v32  ;;  %604 = vmatpush.msrb.mxu1 %v522_v50 }
  0x50   : > { %626 = vmatpush.msrb.mxu2 %v536_v51  ;;  %645 = vmatpush.msrb.mxu3 %v553_v52 }
  0x51   : > { %493 = vmatmul.f32.vlgmr.msra.gmra.mxu3 %v412_v33  ;;  %585 = vmatpush.msrb.mxu0 %v505_v53 }
  0x52   : > { %605 = vmatpush.msrb.mxu1 %v521_v54  ;;  %627 = vmatpush.msrb.mxu2 %v535_v55 }
  0x53   : > { %646 = vmatpush.msrb.mxu3 %v552_v56  ;;  %433 = vmatmul.f32.vlgmr.msra.gmra.mxu0 %v409_v34 }
  0x54   : > { %453 = vmatmul.f32.vlgmr.msra.gmra.mxu1 %v410_v35  ;;  %586 = vmatpush.msrb.mxu0 %v504_v57 }
  0x55   : > { %606 = vmatpush.msrb.mxu1 %v520_v58  ;;  %628 = vmatpush.msrb.mxu2 %v534_v59 }
  0x56   : > { %647 = vmatpush.msrb.mxu3 %v551_v60  ;;  %587 = vmatpush.msrb.mxu0 %v503_v61 }
  0x57   : > { %607 = vmatpush.msrb.mxu1 %v519_v62  ;;  %629 = vmatpush.msrb.mxu2 %v533_v63 }
  0x58   : > { %648 = vmatpush.msrb.mxu3 %v550_v0  ;;  %630 = vmatmul.f32.vlgmr.msrb.gmra.mxu2 %v568_v1 }
  0x59   : > { %588 = vmatpush.msrb.mxu0 %v502_v2  ;;  %608 = vmatpush.msrb.mxu1 %v518_v3 }
  0x5a   : > { %649 = vmatpush.msrb.mxu3 %v549_v4 }
  0x5b   : > { %650 = vmatmul.f32.vlgmr.msrb.gmra.mxu3 %v569_v5  ;;  %589 = vmatpush.msrb.mxu0 %v501_v6 }
  0x5c   : > { %609 = vmatpush.msrb.mxu1 %v517_v7  ;;  %590 = vmatmul.f32.vlgmr.msrb.gmra.mxu0 %v566_v8 }
  0x5d   : > { %610 = vmatmul.f32.vlgmr.msrb.gmra.mxu1 %v567_v9 }
  0xd0   : > { %v434_v10 = vpop.f32.mrf.mxu0 }
  0xd1   : > { %v454_v11 = vpop.f32.mrf.mxu1 }
  0xd2   : > { %v455_v12 = vadd.f32 %v454_v11, %v434_v10  ;;  %v474_v13 = vpop.f32.mrf.mxu2 }
  0xd4   : > { %v475_v14 = vadd.f32 %v474_v13, %v455_v12  ;;  %v494_v15 = vpop.f32.mrf.mxu3 }
  0xd6   : > { %v495_v17 = vadd.f32 %v494_v15, %v475_v14 }
  0xd8   : > { %v497_v18 = vadd.f32 %v495_v17, %v342_v16 }
  0xd9   : > { %v591_v19 = vpop.f32.mrf.mxu0 }
  0xda   : > { %499 = vst.msk [vmem:[#allocation2] sm:$0x3] %vm498_vm1, %v497_v18  ;;  %v611_v20 = vpop.f32.mrf.mxu1 }
  0xdb   : > { %v612_v21 = vadd.f32 %v611_v20, %v591_v19  ;;  %v631_v22 = vpop.f32.mrf.mxu2 }
  0xdd   : > { %v632_v23 = vadd.f32 %v631_v22, %v612_v21 }
  0xde   : > { %v651_v25 = vpop.f32.mrf.mxu3 }
  0xdf   : > { %v652_v26 = vadd.f32 %v651_v25, %v632_v23  ;;  %659 = sbr.rel (%p811_p6) target bundleno = 253 (0xfd), region = 52 }
  0xe1   : > { %v654_v27 = vadd.f32 %v652_v26, %v500_v24 }
  0xe3   : > { %655 = vst.msk [vmem:[#allocation3] sm:$0x3] %vm498_vm1, %v654_v27 }
  0xe4   : > { %v660_v28 = vld [vmem:[#allocation2] sm:$0x3]  ;;  %v850_v29 = vld [vmem:[%s1204_s2] ss:$0 sm:$0xff] }
  0xe5   : > { %v851_v31 = vld [vmem:[%s1206_s4] ss:$0 sm:$0xff]  ;;  %v665_v32 = vadd.f32 %v850_v29, %v660_v28 }
  0xe6   : > { %v674_v36 = vld [vmem:[%s1207_s5] sm:$0x3] }
  0xe7   : > { %672 = vst.msk [vmem:[#allocation4] sm:$0x3] %vm498_vm1, %v665_v32 }
  0xea   : > { %v666_v30 = vld [vmem:[#allocation3] sm:$0x3] }
  0xeb   : > { %v671_v33 = vadd.f32 %v851_v31, %v666_v30 }
  0xed   : > { %673 = vst.msk [vmem:[#allocation6] sm:$0x3] %vm498_vm1, %v671_v33  ;;  %v675_v34 = vmul.f32 0.5, %v671_v33 }
  0xef   : > { %v676_v35 = vmul.f32 1.442695, %v675_v34 }
  0xf1   : > { %852 = vpow2.f32 %v676_v35 }
  0xf7   : > { %v853_v37 = vpop.eup %852 }
  0xf8   : > { %v678_v38 = vmul.f32 %v853_v37, %v674_v36 }
  0xfa   : > { %v679_v39 = vadd.f32 %v678_v38, %v665_v32 }
  0xfc   : > { %680 = vst.msk [vmem:[#allocation8] sm:$0x3] %vm498_vm1, %v679_v39 }
  0xfd PF: > { %p832_p7 = scmp.eq.s32.totalorder %s1009_s28, 1  ;;  %s955_s26 = smov [#allocation6]  }
  0xfe   : > { %s699_s29 = sshll.u32 %s955_s26, 4  ;;  %s701_s10 = sshll.u32 %s1209_s7, 4  ;;  %s700_s29 = int_to_ptr.vmem [resolvable:$true] %s699_s29  ;;  %s702_s10 = int_to_ptr.hbm [resolvable:$true] %s701_s10 }
  0xff   : > { %823 = dma.vmem_to_hbm [thread:$0]  (%p832_p7), %s700_s29, 32, %s702_s10, [#allocation7]  }
 0x100   : > { %s689_s13 = sshll.u32 %s1208_s6, 4  ;;  %s956_s14 = smov [#allocation4]   ;;  %s690_s13 = int_to_ptr.hbm [resolvable:$true] %s689_s13 }
 0x101   : > { %s687_s15 = sshll.u32 %s956_s14, 4  ;;  %s957_s16 = smov [#allocation8]   ;;  %s688_s15 = int_to_ptr.vmem [resolvable:$true] %s687_s15 }
 0x102   : > { %821 = dma.vmem_to_hbm [thread:$0]  (%p832_p7), %s688_s15, 32, %s690_s13, [#allocation5]  }
 0x103   : > { %s711_s17 = sshll.u32 %s957_s16, 4  ;;  %s713_s20 = sshll.u32 %s1210_s8, 4  ;;  %s712_s17 = int_to_ptr.vmem [resolvable:$true] %s711_s17  ;;  %s714_s20 = int_to_ptr.hbm [resolvable:$true] %s713_s20 }
 0x104   : > { %825 = dma.vmem_to_hbm [thread:$0]  (%p832_p7), %s712_s17, 32, %s714_s20, [#allocation7]  }
 0x105   : > { %943 = dma.done.wait (%p832_p7), [#allocation5], 32  }
 0x106   : > { %945 = vsyncadd (%p832_p7), [#allocation5], 4294967264 }
 0x107   : > { %947 = dma.done.wait (%p832_p7), [#allocation7], 64  }
 0x108   : > { %949 = vsyncadd (%p832_p7), [#allocation7], 4294967232 }
 0x109 PF: > { %s21_s27 = sadd.s32 1, %s952_s27  }
 0x10a   : > { %p18_p8 = scmp.ge.s32.totalorder %s21_s27, 4  }
 0x10c   :  { %20 = sbr.rel (!%p18_p8) target bundleno = 2 (0x2), region = 101 }
 0x111   :  { %737 = vsyncpa [#allocation5], 1 }
 0x112   :  { %739 = vsyncpa [#allocation5 + $0x1], 1 }
 0x113   :  { %740 = vsyncpa [#allocation7], 1 }

</bundles_post_ra>
